<compile_context>
chip_gen: v7x
topology: tpu7x:2x2x1
jax: 0.10.0
libtpu: 0.0.40
codegen_flags: <defaults>
</compile_context>

<pallas_src>
import functools

import jax
import jax.numpy as jnp
from jax.experimental import pallas as pl
from jax.experimental.pallas import tpu as pltpu


def _round_up(a: int, b: int) -> int:
    return ((a + b - 1) // b) * b


def _default_tile_targets() -> tuple:
    """(tk_target, tn_target): ~8 MiB f32 weight tiles on v6e/v7x, ~4 MiB elsewhere."""
    kind = ""
    try:
        kind = jax.devices()[0].device_kind.lower()
    except Exception:
        pass
    if "v6" in kind or "v7" in kind:
        return 2048, 1024   # 8 MiB weight tile; 2x8 MiB double buffer is still modest
    return 2048, 512        # 4 MiB weight tile (v5e & conservative default)


def _choose_tiling(extent: int, target: int, gran: int, *, min_tiles: int = 1):
    """Pick (tile, num_tiles) with tile % gran == 0 and tile * num_tiles >= extent.

    Prefers the fewest tiles whose residual padding is <= ~2% of the aligned extent, so
    we never stream whole tiles of zero weights while keeping per-grid-step overhead low.
    """
    e = _round_up(extent, gran)
    target = max(_round_up(min(target, e), gran), gran)
    num_lo = max(min_tiles, -(-e // target))
    best = None  # (pad, tile, num)
    for num in range(num_lo, num_lo + 8):
        tile = _round_up(-(-e // num), gran)
        pad = num * tile - e
        if pad * 50 <= e:        # <= 2% wasted bytes: take the fewest tiles that achieve it
            return tile, num
        if best is None or pad < best[0]:
            best = (pad, tile, num)
    return best[1], best[2]


def _gemv_kernel(x_ref, w_ref, o_ref):
    # x_ref: (tk, 1)   input-vector column slice, streamed along K
    # w_ref: (tk, tn)  lane-dense weight tile, streamed + double-buffered
    # o_ref: (1, tn)   f32 output tile; same block index for every k -> resident accumulator
    k = pl.program_id(1)

    @pl.when(k == 0)
    def _():
        o_ref[...] = jnp.zeros_like(o_ref)

    # VPU formulation of the GEMV: broadcast x across lanes, multiply, reduce over the
    # sublane (K) axis. A (1, tk) x (tk, tn) MXU dot would make the large weight tile the
    # stationary operand and risk being push-bound; this stays well under the DMA time.
    o_ref[...] += jnp.sum(x_ref[...] * w_ref[...], axis=0, keepdims=True)


@functools.partial(jax.jit, static_argnames=("n_out", "tk", "tn"))
def _linear_forward(x, w_padded, *, n_out, tk, tn):
    (k_in,) = x.shape
    k_pad, n_pad = w_padded.shape
    num_k, num_n = k_pad // tk, n_pad // tn

    # x is tiny (K floats): per-call padding is negligible HBM traffic (unlike W).
    x_col = jnp.pad(x.astype(jnp.float32).reshape(k_in, 1),
                    ((0, k_pad - k_in), (0, 0)))

    # Double-buffered VMEM footprint ((8,128)-tile padded) + headroom; never claim the
    # whole physical VMEM (v7x only has 64 MiB per TensorCore).
    w_bytes = 2 * tk * tn * 4
    x_bytes = 2 * tk * 128 * 4       # (tk, 1) pads to 128 lanes in VMEM
    o_bytes = 2 * 8 * tn * 4         # (1, tn) pads to 8 sublanes
    vmem_limit = int(max(w_bytes + x_bytes + o_bytes + (8 << 20), 16 << 20))

    out = pl.pallas_call(
        _gemv_kernel,
        out_shape=jax.ShapeDtypeStruct((1, n_pad), jnp.float32),
        grid_spec=pltpu.PrefetchScalarGridSpec(
            num_scalar_prefetch=0,
            grid=(num_n, num_k),     # N (parallel) first, K (reduction) innermost
            in_specs=[
                pl.BlockSpec((tk, 1), lambda j, k: (k, 0)),
                pl.BlockSpec((tk, tn), lambda j, k: (k, j)),
            ],
            out_specs=pl.BlockSpec((1, tn), lambda j, k: (0, j)),
        ),
        compiler_params=pltpu.CompilerParams(
            dimension_semantics=("parallel", "arbitrary"),
            vmem_limit_bytes=vmem_limit,
        ),
        cost_estimate=pl.CostEstimate(
            flops=2 * k_pad * n_pad,
            transcendentals=0,
            bytes_accessed=4 * (k_pad * n_pad + k_pad + n_pad),
        ),
    )(x_col, w_padded)

    return out[0, :n_out]


class PallasLinear:
    """Pallas TPU equivalent of the PyTorch LinearLayer: y = x @ W."""

    def __init__(self, weights: jax.Array, *, tk_target=None, tn_target=None):
        K, N = weights.shape
        d_tk, d_tn = _default_tile_targets()
        tk_target = tk_target or d_tk
        tn_target = tn_target or d_tn

        self.n_in, self.n_out = K, N
        # Minimum-padding tile selection (residual padding a few rows/lanes, not a tile).
        self.tk, num_k = _choose_tiling(K, tk_target, 8)
        # >= 2 N-tiles (when N allows) so the "parallel" axis shards over v7x's two
        # TensorCores; harmless on single-core v5e/v6e.
        self.tn, num_n = _choose_tiling(
            N, tn_target, 128, min_tiles=2 if _round_up(N, 128) >= 256 else 1)

        k_pad, n_pad = self.tk * num_k, self.tn * num_n
        # Pad the weights ONCE here (parameter prep), not in the per-call hot path.
        # Zero padding is exact for a matmul. TODO(synk): weights could additionally be
        # cast to bf16 here for ~2x HBM throughput if the model tolerates it.
        self.w_padded = jnp.pad(weights.astype(jnp.float32),
                                ((0, k_pad - K), (0, n_pad - N)))

    def __call__(self, x: jax.Array) -> jax.Array:
        assert x.shape == (self.n_in,)
        return _linear_forward(x, self.w_padded, n_out=self.n_out,
                               tk=self.tk, tn=self.tn)


if __name__ == "__main__":
    # Small shapes implied by the module's forward: x is (n_input_features,).
    n_input_features = 32
    n_output_features = 64

    key = jax.random.PRNGKey(0)
    kx, kw, kx2, kw2 = jax.random.split(key, 4)

    # torch.nn.init.uniform_ draws from U[0, 1) — mirrored deterministically.
    weights = jax.random.uniform(
        kw, (n_input_features, n_output_features), dtype=jnp.float32)
    x = jax.random.normal(kx, (n_input_features,), dtype=jnp.float32)

    layer = PallasLinear(weights)
    y = jax.block_until_ready(layer(x))

    y_ref = x @ weights
    assert y.shape == (n_output_features,)
    assert jnp.allclose(y, y_ref, atol=1e-5, rtol=1e-5)

    # Larger case with both K and N tiled, exercising the grid / resident-output
    # accumulator path (looser atol: f32 accumulation-order difference only).
    K2, N2 = 3000, 1200
    w2 = jax.random.uniform(kw2, (K2, N2), dtype=jnp.float32)
    x2 = jax.random.normal(kx2, (K2,), dtype=jnp.float32)
    layer2 = PallasLinear(w2)
    y2 = jax.block_until_ready(layer2(x2))
    assert jnp.allclose(y2, x2 @ w2, atol=1e-2, rtol=1e-5)

    print("KERNEL_OK")
</pallas_src>

<mosaic_0001>
module attributes {stable_mosaic.version = 11 : i64} {
  func.func @_gemv_kernel(%arg0: i32, %arg1: i32, %arg2: memref<32x1xf32, #tpu.memory_space<vmem>>, %arg3: memref<32x128xf32, #tpu.memory_space<vmem>>, %arg4: memref<1x128xf32, #tpu.memory_space<vmem>>) attributes {dimension_semantics = [#tpu.dimension_semantics<parallel>, #tpu.dimension_semantics<arbitrary>], iteration_bounds = array<i64: 1, 1>, scalar_prefetch = 0 : i64, scratch_operands = 0 : i64, tpu.core_type = #tpu.core_type<tc>, window_params = [{transform_indices = @transform_0, window_bounds = array<i64: 32, 1>}, {transform_indices = @transform_1, window_bounds = array<i64: 32, 128>}, {transform_indices = @transform_2, window_bounds = array<i64: 1, 128>}]} {
    %c0_i32 = arith.constant 0 : i32
    %0 = arith.cmpi eq, %arg1, %c0_i32 : i32
    %1 = arith.extui %0 : i1 to i32
    %c0_i32_0 = arith.constant 0 : i32
    %2 = arith.cmpi ne, %1, %c0_i32_0 : i32
    scf.if %2 {
      %cst_8 = arith.constant 0.000000e+00 : f32
      %12 = vector.broadcast %cst_8 : f32 to vector<1x128xf32>
      %c0_9 = arith.constant 0 : index
      %c0_10 = arith.constant 0 : index
      %13 = vector.load %arg4[%c0_9, %c0_10] : memref<1x128xf32, #tpu.memory_space<vmem>>, vector<1x128xf32>
      tpu.vector_store %arg4[%c0_9, %c0_10], %12 {strides = array<i32>} : memref<1x128xf32, #tpu.memory_space<vmem>>, vector<1x128xf32>,
    } else {
    }
    %c0 = arith.constant 0 : index
    %c0_1 = arith.constant 0 : index
    %3 = vector.load %arg4[%c0, %c0_1] : memref<1x128xf32, #tpu.memory_space<vmem>>, vector<1x128xf32>
    %c0_2 = arith.constant 0 : index
    %c0_3 = arith.constant 0 : index
    %4 = vector.load %arg2[%c0_2, %c0_3] : memref<32x1xf32, #tpu.memory_space<vmem>>, vector<32x1xf32>
    %c0_4 = arith.constant 0 : index
    %c0_5 = arith.constant 0 : index
    %5 = vector.load %arg3[%c0_4, %c0_5] : memref<32x128xf32, #tpu.memory_space<vmem>>, vector<32x128xf32>
    %6 = vector.broadcast %4 : vector<32x1xf32> to vector<32x128xf32>
    %7 = arith.mulf %6, %5 : vector<32x128xf32>
    %cst = arith.constant dense<0.000000e+00> : vector<128xf32>
    %8 = vector.multi_reduction <add>, %7, %cst [0] : vector<32x128xf32> to vector<128xf32>
    %9 = vector.shape_cast %8 : vector<128xf32> to vector<1x128xf32>
    %10 = arith.addf %3, %9 : vector<1x128xf32>
    %c0_6 = arith.constant 0 : index
    %c0_7 = arith.constant 0 : index
    %11 = vector.load %arg4[%c0_6, %c0_7] : memref<1x128xf32, #tpu.memory_space<vmem>>, vector<1x128xf32>
    tpu.vector_store %arg4[%c0_6, %c0_7], %10 {strides = array<i32>} : memref<1x128xf32, #tpu.memory_space<vmem>>, vector<1x128xf32>,
    return
  }
  func.func @transform_0(%arg0: i32, %arg1: i32) -> (i32, i32) {
    %c0_i32 = arith.constant 0 : i32
    %c0_i32_0 = arith.constant 0 : i32
    return %arg1, %c0_i32 : i32, i32
  }
  func.func @transform_1(%arg0: i32, %arg1: i32) -> (i32, i32) {
    %c0_i32 = arith.constant 0 : i32
    return %arg1, %arg0 : i32, i32
  }
  func.func @transform_2(%arg0: i32, %arg1: i32) -> (i32, i32) {
    %c0_i32 = arith.constant 0 : i32
    %c0_i32_0 = arith.constant 0 : i32
    return %c0_i32, %arg0 : i32, i32
  }
}

</mosaic_0001>

<bundles_post_ra>
// kernel: _linear_forward.1
= control target key start
LH: loop header
LB: loop body
LE: loop exit
PB: predicated region body
PF: predicated region fallthrough
CT: control target
= control target key end

     0   :  { %v68_v0 = vmov 0   ;;  %v69_v5 = vmov 0.0   ;;  %s118_s0 = inlined_call_operand.vmem [shape: f32[32,1], index: 0, kind: input, shape index: {}]   ;;  %s119_s2 = inlined_call_operand.vmem [shape: f32[1,128], index: 2, kind: output, shape index: {}]   ;;  %s120_s1 = inlined_call_operand.vmem [shape: f32[32,128], index: 1, kind: input, shape index: {}]  }
   0x1   :  { %67 = vset.pattern.permute.xlu1 %v68_v0  ;;  %66 = vset.pattern.permute.xlu0 %v68_v0  ;;  %v19_v1 = vld [vmem:[%s118_s0 + $0x10] sm:$0xff]  ;;  %v17_v2 = vld [vmem:[%s118_s0] sm:$0xff]  ;;  %v20_v3 = vld [vmem:[%s118_s0 + $0x18] sm:$0xff]  ;;  %15 = vst [vmem:[%s119_s2] sm:$0x1] %v69_v5 }
   0x2   :  { %37 = vperm.xlu1 %67, %v19_v1   ;;  %27 = vperm.xlu0 %66, %v17_v2   ;;  %v18_v4 = vld [vmem:[%s118_s0 + $0x8] sm:$0xff]  ;;  %v21_v8 = vld [vmem:[%s120_s1] sm:$0xff]  ;;  %v23_v10 = vld [vmem:[%s120_s1 + $0x10] sm:$0xff] }
   0x3   :  { %v22_v9 = vld [vmem:[%s120_s1 + $0x8] sm:$0xff]  ;;  %v24_v14 = vld [vmem:[%s120_s1 + $0x18] sm:$0xff] }
   0x6   :  { %42 = vperm.xlu1 %67, %v20_v3   ;;  %32 = vperm.xlu0 %66, %v18_v4  }
   0x8   :  { %v16_v26 = vld [vmem:[%s119_s2] sm:$0x1] }
  0x81   :  { %v38_v6 = vpop.permute.xlu1 %37  ;;  %v28_v7 = vpop.permute.xlu0 %27 }
  0x82   :  { %v45_v12 = vmul.f32 %v28_v7, %v21_v8  ;;  %v47_v16 = vmul.f32 %v38_v6, %v23_v10 }
  0x85   :  { %v33_v11 = vpop.permute.xlu0 %32  ;;  %v43_v15 = vpop.permute.xlu1 %42 }
  0x86   :  { %v46_v13 = vmul.f32 %v33_v11, %v22_v9  ;;  %v48_v18 = vmul.f32 %v43_v15, %v24_v14 }
  0x88   :  { %v49_v17 = vadd.f32 %v46_v13, %v45_v12 }
  0x8a   :  { %v50_v19 = vadd.f32 %v49_v17, %v47_v16 }
  0x8c   :  { %v51_v20 = vadd.f32 %v50_v19, %v48_v18 }
  0x8e   :  { %v52_v21 = vrot.slane %v51_v20, 4 }
  0x90   :  { %v53_v22 = vadd.f32 %v52_v21, %v51_v20 }
  0x92   :  { %v54_v23 = vrot.slane %v53_v22, 2 }
  0x94   :  { %v55_v24 = vadd.f32 %v54_v23, %v53_v22 }
  0x96   :  { %v56_v25 = vrot.slane %v55_v24, 1 }
  0x98   :  { %v57_v27 = vadd.f32 %v56_v25, %v55_v24 }
  0x9a   :  { %v58_v28 = vadd.f32 %v57_v27, %v16_v26 }
  0x9c   :  { %59 = vst [vmem:[%s119_s2] sm:$0x1] %v58_v28 }

</bundles_post_ra>
